<compile_context>
chip_gen: v5e
topology: v5e:2x2
jax: 0.10.0
libtpu: 0.0.40
codegen_flags: <defaults>
</compile_context>

<pallas_src>
import functools

import jax
import jax.numpy as jnp
from jax.experimental import pallas as pl
from jax.experimental.pallas import tpu as pltpu

EPS = 1e-5            # nn.BatchNorm1d default eps
MAX_LANE_TILE = 512   # length-tile size once L_out is large (multiple of 128)


def block_kernel(x_ref, w_ref, b_ref, gamma_ref, beta_ref, out_ref,
                 sum_ref, sumsq_ref, *,
                 stride, padding, l_valid, inv_count,
                 norm, skipcon, needs_mask, single_tile):
    """One (phase, batch, length-tile) step of fused conv + BN + ReLU (+ skip).

    x_ref:              (1, C_in, L_x)   padded input row (VMEM-resident per batch)
    w_ref:              (K, C_out, C_in) conv weights
    b/gamma/beta_ref:   (C_out, 1)
    out_ref:            (1, C_out, TL)   lane-dense output tile
    sum_ref/sumsq_ref:  (C_out, 1)       cross-tile BatchNorm accumulators
    """
    K, C_out, C_in = w_ref.shape
    TL = out_ref.shape[-1]

    phase = pl.program_id(0)
    n = pl.program_id(1)
    t = pl.program_id(2)
    # First output position of this tile.  Kept static when there is a single
    # length tile so all lane slices have static offsets; otherwise hint the
    # compiler that the tile start is 128-aligned (TL is a multiple of 128).
    if single_tile:
        j0 = 0
    else:
        j0 = pl.multiple_of(t * TL, 128)

    # ---- conv tile: in-kernel "im2col" as K shifted lane views of resident x ----
    conv = jnp.zeros((C_out, TL), jnp.float32)
    for k in range(K):                              # K is small -> static unroll
        start = j0 * stride + k
        if stride == 1:
            xs = x_ref[0, :, pl.ds(start, TL)]              # (C_in, TL)
        else:
            xs = x_ref[0, :, pl.ds(start, TL, stride)]      # strided lane read
        conv = conv + jnp.dot(w_ref[k], xs, preferred_element_type=jnp.float32)
    if not norm:
        # With BatchNorm the per-channel bias cancels against the mean subtract,
        # so it is only applied in the no-norm path.
        conv = conv + b_ref[...]                    # (C_out, 1) broadcast over lanes

    if norm:
        @pl.when((phase == 0) & (n == 0) & (t == 0))
        def _init_stats():
            sum_ref[...] = jnp.zeros_like(sum_ref)
            sumsq_ref[...] = jnp.zeros_like(sumsq_ref)

        @pl.when(phase == 0)
        def _accumulate_stats():
            c = conv
            if needs_mask:     # L_out was rounded up to a lane multiple
                col = jax.lax.broadcasted_iota(jnp.int32, c.shape, 1) + j0
                c = jnp.where(col < l_valid, c, 0.0)
            sum_ref[...] = sum_ref[...] + jnp.sum(c, axis=1, keepdims=True)
            sumsq_ref[...] = sumsq_ref[...] + jnp.sum(c * c, axis=1, keepdims=True)

    def _finalize():
        out = conv
        if norm:
            mean = sum_ref[...] * inv_count                        # (C_out, 1)
            var = jnp.maximum(sumsq_ref[...] * inv_count - mean * mean, 0.0)
            scale = jax.lax.rsqrt(var + EPS) * gamma_ref[...]
            out = (out - mean) * scale + beta_ref[...]
        out = jnp.maximum(out, 0.0)                                # ReLU
        if skipcon:
            # identity = x[n, :, j0:j0+TL] == x_pad[n, :, padding+j0 : padding+j0+TL]
            ident = x_ref[0, :, pl.ds(padding + j0, TL)]
            out = jnp.maximum(out + ident, 0.0)                    # ReLU(out + x)
        out_ref[0] = out.astype(out_ref.dtype)

    if norm:
        pl.when(phase == 1)(_finalize)
    else:
        _finalize()


def block_forward(x, w, b, gamma, beta, *, stride, padding, norm, skipcon):
    """x: (N, C_in, L)   w: (C_out, C_in, K)   b/gamma/beta: (C_out,)."""
    N, C_in, L = x.shape
    C_out, C_in_w, K = w.shape
    assert C_in_w == C_in
    L_out = (L + 2 * padding - K) // stride + 1
    if skipcon:
        assert C_in == C_out and L_out == L, "skip connection needs matching shapes"

    # ---- length tiling (lane axis) ----
    if L_out <= MAX_LANE_TILE:
        TL, L_out_p = L_out, L_out          # single full-width tile
    else:
        TL = MAX_LANE_TILE                  # multiple of 128 -> unmasked stores
        L_out_p = ((L_out + TL - 1) // TL) * TL
    num_t = L_out_p // TL
    single_tile = (num_t == 1)

    # ---- pad x once: conv padding + tail so every tile / identity slice is in range ----
    L_x = (L_out_p - 1) * stride + K
    if skipcon:
        L_x = max(L_x, padding + L_out_p)
    L_x = max(L_x, L + 2 * padding)
    x_pad = jnp.pad(x.astype(jnp.float32),
                    ((0, 0), (0, 0), (padding, L_x - L - padding)))
    # NOTE: one padded (C_in, L_x) row must fit VMEM (fine for 1-D conv channel
    # counts); halo-blocked x tiles would be the next step for extreme L.

    w_k = jnp.transpose(w, (2, 0, 1)).astype(jnp.float32)       # (K, C_out, C_in)
    b2 = b.reshape(C_out, 1).astype(jnp.float32)
    g2 = gamma.reshape(C_out, 1).astype(jnp.float32)
    be2 = beta.reshape(C_out, 1).astype(jnp.float32)

    num_phases = 2 if norm else 1
    grid = (num_phases, N, num_t)

    if norm:
        # Phase 0 accumulates global BN stats into scratch -> every axis carries
        # a cross-iteration dependency, so all "arbitrary".
        dims = ("arbitrary", "arbitrary", "arbitrary")
        # During phase 0, park the output on block (0,0,0) so no garbage tiles
        # are flushed to HBM; phase 1 then visits each output block exactly once.
        out_map = lambda p, n, t: (n * p, 0, t * p)
    else:
        dims = ("arbitrary", "parallel", "parallel")
        out_map = lambda p, n, t: (n, 0, t)

    kernel = functools.partial(
        block_kernel,
        stride=stride, padding=padding, l_valid=L_out,
        inv_count=1.0 / float(N * L_out),
        norm=norm, skipcon=skipcon,
        needs_mask=(L_out_p != L_out), single_tile=single_tile)

    grid_spec = pltpu.PrefetchScalarGridSpec(
        num_scalar_prefetch=0,
        grid=grid,
        in_specs=[
            # Full padded row per batch; block index ignores (phase, tile) so it
            # stays VMEM-resident across all length tiles of a batch (no re-DMA).
            pl.BlockSpec((1, C_in, L_x), lambda p, n, t: (n, 0, 0)),
            pl.BlockSpec((K, C_out, C_in), lambda p, n, t: (0, 0, 0)),
            pl.BlockSpec((C_out, 1), lambda p, n, t: (0, 0)),
            pl.BlockSpec((C_out, 1), lambda p, n, t: (0, 0)),
            pl.BlockSpec((C_out, 1), lambda p, n, t: (0, 0)),
        ],
        out_specs=pl.BlockSpec((1, C_out, TL), out_map),
        scratch_shapes=[pltpu.VMEM((C_out, 1), jnp.float32),
                        pltpu.VMEM((C_out, 1), jnp.float32)],
    )

    out = pl.pallas_call(
        kernel,
        out_shape=jax.ShapeDtypeStruct((N, C_out, L_out_p), jnp.float32),
        grid_spec=grid_spec,
        compiler_params=pltpu.CompilerParams(
            dimension_semantics=dims,
            # Explicit scoped-VMEM budget, safe on v5e/v6e/v7x; tiles here are tiny.
            vmem_limit_bytes=32 * 1024 * 1024,
        ),
    )(x_pad, w_k, b2, g2, be2)

    return out[:, :, :L_out]


def block_reference(x, w, b, gamma, beta, *, stride, padding, norm, skipcon):
    out = jax.lax.conv_general_dilated(
        x, w, window_strides=(stride,), padding=[(padding, padding)],
        dimension_numbers=("NCH", "OIH", "NCH"))
    out = out + b[None, :, None]
    if norm:
        mean = out.mean(axis=(0, 2), keepdims=True)
        var = ((out - mean) ** 2).mean(axis=(0, 2), keepdims=True)
        out = (out - mean) * jax.lax.rsqrt(var + EPS)
        out = out * gamma[None, :, None] + beta[None, :, None]
    out = jnp.maximum(out, 0.0)
    if skipcon:
        out = jnp.maximum(out + x, 0.0)
    return out


if __name__ == "__main__":
    key = jax.random.PRNGKey(0)

    configs = [
        # (name, N, C_in, C_out, L, K, stride, padding, norm, skipcon)
        ("norm+skip", 2, 4, 4, 16, 3, 1, 1, True, True),    # Block(4,4,3,1,1,True,True)
        ("plain",     2, 4, 8, 16, 3, 1, 0, False, False),  # Block(4,8,3,1,0,False,False)
    ]
    for (name, N, C_in, C_out, L, K, stride, padding, norm, skipcon) in configs:
        k1, k2, k3, k4, k5, key = jax.random.split(key, 6)
        x = jax.random.normal(k1, (N, C_in, L), jnp.float32)
        w = 0.3 * jax.random.normal(k2, (C_out, C_in, K), jnp.float32)
        b = 0.1 * jax.random.normal(k3, (C_out,), jnp.float32)
        gamma = 1.0 + 0.1 * jax.random.normal(k4, (C_out,), jnp.float32)
        beta = 0.1 * jax.random.normal(k5, (C_out,), jnp.float32)

        out = block_forward(x, w, b, gamma, beta, stride=stride, padding=padding,
                            norm=norm, skipcon=skipcon)
        out = jax.block_until_ready(out)

        ref = block_reference(x, w, b, gamma, beta, stride=stride, padding=padding,
                              norm=norm, skipcon=skipcon)
        L_out = (L + 2 * padding - K) // stride + 1
        assert out.shape == (N, C_out, L_out), (name, out.shape)
        err = float(jnp.max(jnp.abs(out - ref)))
        assert jnp.allclose(out, ref, atol=2e-4, rtol=2e-4), (name, err)

    print("KERNEL_OK")
</pallas_src>

<mosaic_0001>
module attributes {stable_mosaic.version = 11 : i64} {
  func.func @block_kernel(%arg0: i32, %arg1: i32, %arg2: i32, %arg3: memref<1x4x18xf32, #tpu.memory_space<vmem>>, %arg4: memref<3x4x4xf32, #tpu.memory_space<vmem>>, %arg5: memref<4x1xf32, #tpu.memory_space<vmem>>, %arg6: memref<4x1xf32, #tpu.memory_space<vmem>>, %arg7: memref<4x1xf32, #tpu.memory_space<vmem>>, %arg8: memref<1x4x16xf32, #tpu.memory_space<vmem>>, %arg9: memref<4x1xf32, #tpu.memory_space<vmem>>, %arg10: memref<4x1xf32, #tpu.memory_space<vmem>>) attributes {dimension_semantics = [#tpu.dimension_semantics<arbitrary>, #tpu.dimension_semantics<arbitrary>, #tpu.dimension_semantics<arbitrary>], iteration_bounds = array<i64: 2, 2, 1>, scalar_prefetch = 0 : i64, scratch_operands = 2 : i64, tpu.core_type = #tpu.core_type<tc>, window_params = [{transform_indices = @transform_0, window_bounds = array<i64: 1, 4, 18>}, {pipeline_mode = #tpu.pipeline_mode<synchronous>, transform_indices = @transform_1, window_bounds = array<i64: 3, 4, 4>}, {pipeline_mode = #tpu.pipeline_mode<synchronous>, transform_indices = @transform_2, window_bounds = array<i64: 4, 1>}, {pipeline_mode = #tpu.pipeline_mode<synchronous>, transform_indices = @transform_3, window_bounds = array<i64: 4, 1>}, {pipeline_mode = #tpu.pipeline_mode<synchronous>, transform_indices = @transform_4, window_bounds = array<i64: 4, 1>}, {transform_indices = @transform_5, window_bounds = array<i64: 1, 4, 16>}]} {
    %cst = arith.constant 0.000000e+00 : f32
    %0 = vector.broadcast %cst : f32 to vector<4x16xf32>
    %c0 = arith.constant 0 : index
    %c0_0 = arith.constant 0 : index
    %c0_1 = arith.constant 0 : index
    %1 = vector.load %arg3[%c0, %c0_0, %c0_1] : memref<1x4x18xf32, #tpu.memory_space<vmem>>, vector<1x4x16xf32>
    %2 = vector.shape_cast %1 : vector<1x4x16xf32> to vector<4x16xf32>
    %c0_2 = arith.constant 0 : index
    %c0_3 = arith.constant 0 : index
    %c0_4 = arith.constant 0 : index
    %3 = vector.load %arg4[%c0_2, %c0_3, %c0_4] : memref<3x4x4xf32, #tpu.memory_space<vmem>>, vector<1x4x4xf32>
    %4 = vector.shape_cast %3 : vector<1x4x4xf32> to vector<4x4xf32>
    %cst_5 = arith.constant dense<0.000000e+00> : vector<4x16xf32>
    %5 = tpu.matmul %4, %2, %cst_5 {dimension_numbers = #tpu.dot_dimension_numbers<[1], [0], [0], [1], [0, 0, 1, 1], [], []>} : vector<4x4xf32>, vector<4x16xf32>, vector<4x16xf32> -> vector<4x16xf32>
    %6 = arith.addf %0, %5 : vector<4x16xf32>
    %c0_6 = arith.constant 0 : index
    %c0_7 = arith.constant 0 : index
    %c1 = arith.constant 1 : index
    %7 = vector.load %arg3[%c0_6, %c0_7, %c1] : memref<1x4x18xf32, #tpu.memory_space<vmem>>, vector<1x4x16xf32>
    %8 = vector.shape_cast %7 : vector<1x4x16xf32> to vector<4x16xf32>
    %c1_8 = arith.constant 1 : index
    %c0_9 = arith.constant 0 : index
    %c0_10 = arith.constant 0 : index
    %9 = vector.load %arg4[%c1_8, %c0_9, %c0_10] : memref<3x4x4xf32, #tpu.memory_space<vmem>>, vector<1x4x4xf32>
    %10 = vector.shape_cast %9 : vector<1x4x4xf32> to vector<4x4xf32>
    %cst_11 = arith.constant dense<0.000000e+00> : vector<4x16xf32>
    %11 = tpu.matmul %10, %8, %cst_11 {dimension_numbers = #tpu.dot_dimension_numbers<[1], [0], [0], [1], [0, 0, 1, 1], [], []>} : vector<4x4xf32>, vector<4x16xf32>, vector<4x16xf32> -> vector<4x16xf32>
    %12 = arith.addf %6, %11 : vector<4x16xf32>
    %c0_12 = arith.constant 0 : index
    %c0_13 = arith.constant 0 : index
    %c2 = arith.constant 2 : index
    %13 = vector.load %arg3[%c0_12, %c0_13, %c2] : memref<1x4x18xf32, #tpu.memory_space<vmem>>, vector<1x4x16xf32>
    %14 = vector.shape_cast %13 : vector<1x4x16xf32> to vector<4x16xf32>
    %c2_14 = arith.constant 2 : index
    %c0_15 = arith.constant 0 : index
    %c0_16 = arith.constant 0 : index
    %15 = vector.load %arg4[%c2_14, %c0_15, %c0_16] : memref<3x4x4xf32, #tpu.memory_space<vmem>>, vector<1x4x4xf32>
    %16 = vector.shape_cast %15 : vector<1x4x4xf32> to vector<4x4xf32>
    %cst_17 = arith.constant dense<0.000000e+00> : vector<4x16xf32>
    %17 = tpu.matmul %16, %14, %cst_17 {dimension_numbers = #tpu.dot_dimension_numbers<[1], [0], [0], [1], [0, 0, 1, 1], [], []>} : vector<4x4xf32>, vector<4x16xf32>, vector<4x16xf32> -> vector<4x16xf32>
    %18 = arith.addf %12, %17 : vector<4x16xf32>
    %c0_i32 = arith.constant 0 : i32
    %19 = arith.cmpi eq, %arg0, %c0_i32 : i32
    %c0_i32_18 = arith.constant 0 : i32
    %20 = arith.cmpi eq, %arg1, %c0_i32_18 : i32
    %21 = arith.andi %19, %20 : i1
    %c0_i32_19 = arith.constant 0 : i32
    %22 = arith.cmpi eq, %arg2, %c0_i32_19 : i32
    %23 = arith.andi %21, %22 : i1
    %24 = arith.extui %23 : i1 to i32
    %c0_i32_20 = arith.constant 0 : i32
    %25 = arith.cmpi ne, %24, %c0_i32_20 : i32
    scf.if %25 {
      %cst_24 = arith.constant 0.000000e+00 : f32
      %32 = vector.broadcast %cst_24 : f32 to vector<4x1xf32>
      %c0_25 = arith.constant 0 : index
      %c0_26 = arith.constant 0 : index
      %33 = vector.load %arg9[%c0_25, %c0_26] : memref<4x1xf32, #tpu.memory_space<vmem>>, vector<4x1xf32>
      tpu.vector_store %arg9[%c0_25, %c0_26], %32 {strides = array<i32>} : memref<4x1xf32, #tpu.memory_space<vmem>>, vector<4x1xf32>,
      %cst_27 = arith.constant 0.000000e+00 : f32
      %34 = vector.broadcast %cst_27 : f32 to vector<4x1xf32>
      %c0_28 = arith.constant 0 : index
      %c0_29 = arith.constant 0 : index
      %35 = vector.load %arg10[%c0_28, %c0_29] : memref<4x1xf32, #tpu.memory_space<vmem>>, vector<4x1xf32>
      tpu.vector_store %arg10[%c0_28, %c0_29], %34 {strides = array<i32>} : memref<4x1xf32, #tpu.memory_space<vmem>>, vector<4x1xf32>,
    } else {
    }
    %c0_i32_21 = arith.constant 0 : i32
    %26 = arith.cmpi eq, %arg0, %c0_i32_21 : i32
    %27 = arith.extui %26 : i1 to i32
    %c0_i32_22 = arith.constant 0 : i32
    %28 = arith.cmpi ne, %27, %c0_i32_22 : i32
    scf.if %28 {
      %c0_24 = arith.constant 0 : index
      %c0_25 = arith.constant 0 : index
      %32 = vector.load %arg9[%c0_24, %c0_25] : memref<4x1xf32, #tpu.memory_space<vmem>>, vector<4x1xf32>
      %cst_26 = arith.constant dense<0.000000e+00> : vector<4xf32>
      %33 = vector.multi_reduction <add>, %18, %cst_26 [1] : vector<4x16xf32> to vector<4xf32>
      %34 = vector.shape_cast %33 : vector<4xf32> to vector<4x1xf32>
      %35 = arith.addf %32, %34 : vector<4x1xf32>
      %c0_27 = arith.constant 0 : index
      %c0_28 = arith.constant 0 : index
      %36 = vector.load %arg9[%c0_27, %c0_28] : memref<4x1xf32, #tpu.memory_space<vmem>>, vector<4x1xf32>
      tpu.vector_store %arg9[%c0_27, %c0_28], %35 {strides = array<i32>} : memref<4x1xf32, #tpu.memory_space<vmem>>, vector<4x1xf32>,
      %c0_29 = arith.constant 0 : index
      %c0_30 = arith.constant 0 : index
      %37 = vector.load %arg10[%c0_29, %c0_30] : memref<4x1xf32, #tpu.memory_space<vmem>>, vector<4x1xf32>
      %38 = arith.mulf %18, %18 : vector<4x16xf32>
      %cst_31 = arith.constant dense<0.000000e+00> : vector<4xf32>
      %39 = vector.multi_reduction <add>, %38, %cst_31 [1] : vector<4x16xf32> to vector<4xf32>
      %40 = vector.shape_cast %39 : vector<4xf32> to vector<4x1xf32>
      %41 = arith.addf %37, %40 : vector<4x1xf32>
      %c0_32 = arith.constant 0 : index
      %c0_33 = arith.constant 0 : index
      %42 = vector.load %arg10[%c0_32, %c0_33] : memref<4x1xf32, #tpu.memory_space<vmem>>, vector<4x1xf32>
      tpu.vector_store %arg10[%c0_32, %c0_33], %41 {strides = array<i32>} : memref<4x1xf32, #tpu.memory_space<vmem>>, vector<4x1xf32>,
    } else {
    }
    %c1_i32 = arith.constant 1 : i32
    %29 = arith.cmpi eq, %arg0, %c1_i32 : i32
    %30 = arith.extui %29 : i1 to i32
    %c0_i32_23 = arith.constant 0 : i32
    %31 = arith.cmpi ne, %30, %c0_i32_23 : i32
    scf.if %31 {
      %c0_24 = arith.constant 0 : index
      %c0_25 = arith.constant 0 : index
      %32 = vector.load %arg9[%c0_24, %c0_25] : memref<4x1xf32, #tpu.memory_space<vmem>>, vector<4x1xf32>
      %cst_26 = arith.constant 3.125000e-02 : f32
      %33 = vector.broadcast %cst_26 : f32 to vector<4x1xf32>
      %34 = arith.mulf %32, %33 : vector<4x1xf32>
      %c0_27 = arith.constant 0 : index
      %c0_28 = arith.constant 0 : index
      %35 = vector.load %arg10[%c0_27, %c0_28] : memref<4x1xf32, #tpu.memory_space<vmem>>, vector<4x1xf32>
      %cst_29 = arith.constant 3.125000e-02 : f32
      %36 = vector.broadcast %cst_29 : f32 to vector<4x1xf32>
      %37 = arith.mulf %35, %36 : vector<4x1xf32>
      %38 = arith.mulf %34, %34 : vector<4x1xf32>
      %39 = arith.subf %37, %38 : vector<4x1xf32>
      %cst_30 = arith.constant 0.000000e+00 : f32
      %40 = vector.broadcast %cst_30 : f32 to vector<4x1xf32>
      %41 = arith.maximumf %39, %40 : vector<4x1xf32>
      %cst_31 = arith.constant 9.99999974E-6 : f32
      %42 = vector.broadcast %cst_31 : f32 to vector<4x1xf32>
      %43 = arith.addf %41, %42 : vector<4x1xf32>
      %44 = math.rsqrt %43 : vector<4x1xf32>
      %c0_32 = arith.constant 0 : index
      %c0_33 = arith.constant 0 : index
      %45 = vector.load %arg6[%c0_32, %c0_33] : memref<4x1xf32, #tpu.memory_space<vmem>>, vector<4x1xf32>
      %46 = arith.mulf %44, %45 : vector<4x1xf32>
      %47 = vector.broadcast %34 : vector<4x1xf32> to vector<4x16xf32>
      %48 = arith.subf %18, %47 : vector<4x16xf32>
      %49 = vector.broadcast %46 : vector<4x1xf32> to vector<4x16xf32>
      %50 = arith.mulf %48, %49 : vector<4x16xf32>
      %c0_34 = arith.constant 0 : index
      %c0_35 = arith.constant 0 : index
      %51 = vector.load %arg7[%c0_34, %c0_35] : memref<4x1xf32, #tpu.memory_space<vmem>>, vector<4x1xf32>
      %52 = vector.broadcast %51 : vector<4x1xf32> to vector<4x16xf32>
      %53 = arith.addf %50, %52 : vector<4x16xf32>
      %cst_36 = arith.constant 0.000000e+00 : f32
      %54 = vector.broadcast %cst_36 : f32 to vector<4x16xf32>
      %55 = arith.maximumf %53, %54 : vector<4x16xf32>
      %c0_37 = arith.constant 0 : index
      %c0_38 = arith.constant 0 : index
      %c1_39 = arith.constant 1 : index
      %56 = vector.load %arg3[%c0_37, %c0_38, %c1_39] : memref<1x4x18xf32, #tpu.memory_space<vmem>>, vector<1x4x16xf32>
      %57 = vector.shape_cast %56 : vector<1x4x16xf32> to vector<4x16xf32>
      %58 = arith.addf %55, %57 : vector<4x16xf32>
      %cst_40 = arith.constant 0.000000e+00 : f32
      %59 = vector.broadcast %cst_40 : f32 to vector<4x16xf32>
      %60 = arith.maximumf %58, %59 : vector<4x16xf32>
      %c0_41 = arith.constant 0 : index
      %c0_42 = arith.constant 0 : index
      %c0_43 = arith.constant 0 : index
      %61 = vector.load %arg8[%c0_41, %c0_42, %c0_43] : memref<1x4x16xf32, #tpu.memory_space<vmem>>, vector<1x4x16xf32>
      %62 = vector.shape_cast %61 : vector<1x4x16xf32> to vector<4x16xf32>
      %63 = vector.shape_cast %60 : vector<4x16xf32> to vector<1x4x16xf32>
      tpu.vector_store %arg8[%c0_41, %c0_42, %c0_43], %63 {strides = array<i32>} : memref<1x4x16xf32, #tpu.memory_space<vmem>>, vector<1x4x16xf32>,
    } else {
    }
    return
  }
  func.func @transform_0(%arg0: i32, %arg1: i32, %arg2: i32) -> (i32, i32, i32) {
    %c0_i32 = arith.constant 0 : i32
    %c0_i32_0 = arith.constant 0 : i32
    %c0_i32_1 = arith.constant 0 : i32
    return %arg1, %c0_i32, %c0_i32_0 : i32, i32, i32
  }
  func.func @transform_1(%arg0: i32, %arg1: i32, %arg2: i32) -> (i32, i32, i32) {
    %c0_i32 = arith.constant 0 : i32
    %c0_i32_0 = arith.constant 0 : i32
    %c0_i32_1 = arith.constant 0 : i32
    %c0_i32_2 = arith.constant 0 : i32
    return %c0_i32, %c0_i32_0, %c0_i32_1 : i32, i32, i32
  }
  func.func @transform_2(%arg0: i32, %arg1: i32, %arg2: i32) -> (i32, i32) {
    %c0_i32 = arith.constant 0 : i32
    %c0_i32_0 = arith.constant 0 : i32
    %c0_i32_1 = arith.constant 0 : i32
    return %c0_i32, %c0_i32_0 : i32, i32
  }
  func.func @transform_3(%arg0: i32, %arg1: i32, %arg2: i32) -> (i32, i32) {
    %c0_i32 = arith.constant 0 : i32
    %c0_i32_0 = arith.constant 0 : i32
    %c0_i32_1 = arith.constant 0 : i32
    return %c0_i32, %c0_i32_0 : i32, i32
  }
  func.func @transform_4(%arg0: i32, %arg1: i32, %arg2: i32) -> (i32, i32) {
    %c0_i32 = arith.constant 0 : i32
    %c0_i32_0 = arith.constant 0 : i32
    %c0_i32_1 = arith.constant 0 : i32
    return %c0_i32, %c0_i32_0 : i32, i32
  }
  func.func @transform_5(%arg0: i32, %arg1: i32, %arg2: i32) -> (i32, i32, i32) {
    %0 = arith.muli %arg1, %arg0 : i32
    %1 = arith.muli %arg2, %arg0 : i32
    %c0_i32 = arith.constant 0 : i32
    %c0_i32_0 = arith.constant 0 : i32
    return %0, %c0_i32, %1 : i32, i32, i32
  }
}

</mosaic_0001>

<bundles_post_ra>
// kernel: tpu_custom_call.1
= control target key start
LH: loop header
LB: loop body
LE: loop exit
PB: predicated region body
PF: predicated region fallthrough
CT: control target
= control target key end

     0   :  { %10 = vsyncpa [#allocation5], 0  ;;  %s996_s0 = inlined_call_operand.vmem [shape: f32[2,4,18], index: 0, kind: input, shape index: {}]   ;;  %s997_s1 = inlined_call_operand.hbm [shape: f32[3,4,4], index: 1, kind: input, shape index: {}]   ;;  %s998_s2 = inlined_call_operand.vmem [shape: f32[4,1], index: 2, kind: input, shape index: {}]   ;;  %s999_s3 = inlined_call_operand.vmem [shape: f32[4,1], index: 3, kind: input, shape index: {}]   ;;  %s1000_s4 = inlined_call_operand.vmem [shape: f32[4,1], index: 4, kind: input, shape index: {}]   ;;  %s1001_s5 = inlined_call_operand.hbm [shape: f32[2,4,16], index: 5, kind: output, shape index: {}]  }
   0x1   :  { %11 = vsyncpa [#allocation6], 0 }
   0x2   :  { %13 = vsyncpa [#allocation6 + $0x1], 0  ;;  %s824_s18 = smov 0   ;;  %s826_s19 = smov 0  }
   0x3   :  { %s828_s20 = smov 0   ;;  %s830_s21 = smov 0  }
   0x4   :  { %s832_s2 = smov 0   ;;  %s834_s22 = smov 0  }
   0x5   :  { %s836_s23 = smov 0   ;;  %s838_s24 = smov 0  }
   0x6 LB: > { %s541_s25 = sadd.s32 4294967295, %s784_s24   ;;  %s542_s26 = sadd.s32 4294967294, %s784_s24   ;;  %s784_s24 = sphi %s838_s24, %s19_s24   ;;  %s780_s23 = sphi %s836_s23, %s1012_s23   ;;  %s776_s22 = sphi %s834_s22, %s1011_s22   ;;  %s772_s2 = sphi %s832_s2, %s1010_s2   ;;  %s768_s21 = sphi %s830_s21, %s1009_s21   ;;  %s764_s20 = sphi %s828_s20, %s1008_s20   ;;  %s760_s19 = sphi %s826_s19, %s1007_s19   ;;  %s756_s18 = sphi %s824_s18, %s1006_s18  }
   0x7   : > { %s34_s27 = sadd.s32 1, %s776_s22  ;;  %s38_s28 = sadd.s32 1, %s780_s23 }
   0x8   : > { %p36_p0 = scmp.ge.s32.totalorder %s34_s27, 2  ;;  %s152_s29 = smul.u32 %s776_s22, %s780_s23 }
   0x9   : > { %s161_s30 = sadd.s32 1, %s764_s20  ;;  %p171_p1 = scmp.ne.s32.totalorder %s764_s20, %s760_s19 }
   0xa   : > { %s1014_s27 = smov (%p36_p0, %s34_s27), 0  ;;  %s1016_s28 = smov (!%p36_p0, %s38_s28), %s780_s23 }
   0xb   : > { %p172_p2 = scmp.eq.s32.totalorder %s541_s25, 3  ;;  %p177_p3 = scmp.ne.s32.totalorder %s760_s19, %s756_s18 }
   0xc   : > { %p40_p4 = scmp.ge.s32.totalorder %s1016_s28, 2  ;;  %p178_p5 = scmp.eq.s32.totalorder %s542_s26, 3 }
   0xd   : > { %p878_p6 = por %p172_p2, %p171_p1  ;;  %p543_p7 = scmp.ge.s32.totalorder %s784_s24, 1 }
   0xe   : > { %s1018_s28 = smov (%p40_p4, %s1016_s28), 0  ;;  %p885_p8 = por %p178_p5, %p177_p3 }
   0xf   : > { %p185_p9 = scmp.lt.s32.totalorder %s784_s24, 5  ;;  %s154_s8 = smul.u32 %s1018_s28, %s1014_s27 }
  0x10   : > { %p896_p11 = scmp.eq.s32.totalorder %s541_s25, 0  ;;  %s196_s14 = sshll.u32 %s997_s1, 4  ;;  %s197_s14 = int_to_ptr.hbm [resolvable:$true] %s196_s14 }
  0x11   : > { %p892_p10 = pnand %p543_p7, %p185_p9  ;;  %s156_s11 = ssub.s32 %s152_s29, %s154_s8 }
  0x12   : > { %p159_p12 = scmp.eq.s32.totalorder %s156_s11, 0  ;;  %s786_s16 = smov [#allocation4]  }
  0x13   : > { %p569_p13 = pneg %p892_p10  ;;  %s198_s17 = sshll.u32 %s786_s16, 4  ;;  %s199_s17 = int_to_ptr.vmem [resolvable:$true] %s198_s17 }
  0x14   : > { %s906_s15 = scalar_select %p159_p12, %s764_s20, %s161_s30  }
  0x15   : > { %p570_p0 = pnand %p896_p11, %p569_p13  ;;  %s787_s25 = smov 64  }
  0x16   : > { %s788_s26 = smov 4   ;;  %230 = sbr.rel (%p892_p10) target bundleno = 608 (0x260), region = 40 }
  0x17   : > { %572 = dma.hbm_to_vmem [thread:$0]  (!%p570_p0), %s197_s14, 192, %s199_s17, [#allocation5], %s787_s25, %s787_s25, %s788_s26  }
  0x1b   : > { %747 = dma.done.wait (%p896_p11), [#allocation5], 192  }
  0x1c   : > { %749 = vsyncadd (%p896_p11), [#allocation5], 4294967104  ;;  %p258_p1 = scmp.lt.s32.totalorder %s768_s21, 1  ;;  %s255_s30 = sand.u32 1, %s760_s19   ;;  %vm275_vm0 = vcmask 1043456   ;;  %vm271_vm1 = vcmask 31744  }
  0x1d   : > { %s921_s11 = sshll.u32 %s255_s30, 2  ;;  %s789_s10 = smov 126   ;;  %v265_v1 = vld [vmem:[#allocation4] sm:$0xf]  ;;  %v324_v2 = vld [vmem:[#allocation4 + $0x8] sm:$0xf] }
  0x1e   : > { %s259_s29 = scalar_select %p258_p1, %s768_s21, 1  ;;  %v267_v4 = vld [vmem:[#allocation4 + $0x4] sm:$0xf] }
  0x1f   : > { %s790_s14 = smov 127   ;;  %p353_p2 = scmp.eq.s32.totalorder %s772_s2, 0 }
  0x20   : > { %s549_s8 = sshll.u32 %s259_s29, 2  ;;  %p354_p3 = scmp.eq.s32.totalorder %s768_s21, 0 }
  0x21   : > { %s926_s13 = scalar_lea.vmem %s996_s0, %s549_s8  ;;  %s257_s16 = scalar_lea.vmem [#allocation7], %s921_s11 }
  0x22   : > { %v264_v0 = vld [vmem:[%s926_s13] sm:$0xf]  ;;  %p355_p4 = pnand %p354_p3, %p353_p2 }
  0x23   : > { %325 = vrot.lane.b32.xlu0 %v264_v0, %s789_s10  ;;  %552 = vmatpush.msk.msra.mxu1 %vm275_vm0, %v264_v0 }
  0x24   : > { %553 = vmatmul.msk.f32.vlgmr.msra.gmra.mxu1 %vm271_vm1, %v265_v1 }
  0x2b   : > { %269 = vrot.lane.b32.xlu0 %v264_v0, %s790_s14 }
  0x95   : > { %v326_v3 = vpop.permute.xlu0 %325 }
  0x96   : > { %554 = vmatpush.msk.msra.mxu2 %vm275_vm0, %v326_v3 }
  0x97   : > { %555 = vmatmul.msk.f32.vlgmr.msra.gmra.mxu2 %vm271_vm1, %v324_v2 }
  0x9d   : > { %v270_v5 = vpop.permute.xlu0 %269 }
  0x9e   : > { %550 = vmatpush.msk.msra.mxu0 %vm275_vm0, %v270_v5 }
  0x9f   : > { %551 = vmatmul.msk.f32.vlgmr.msra.gmra.mxu0 %vm271_vm1, %v267_v4 }
  0xa1   : > { %v320_v6 = vpop.f32.mrf.mxu1 }
 0x11a   : > { %v349_v8 = vpop.f32.mrf.mxu2 }
 0x11b   : > { %361 = sbr.rel (%p355_p4) target bundleno = 291 (0x123), region = 48 }
 0x11c   : > { %v295_v7 = vpop.f32.mrf.mxu0 }
 0x11d   : > { %v321_v9 = vadd.f32 %v320_v6, %v295_v7 }
 0x11f   : > { %v931_v10 = vadd.f32 %v349_v8, %v321_v9 }
 0x120   : > { %vm362_vm2 = vcmask 3072   ;;  %v791_v11 = vmov 0.0  }
 0x121   : > { %363 = vst.msk [vmem:[#allocation2] sm:$0xf] %vm362_vm2, %v791_v11 }
 0x122   : > { %364 = vst.msk [vmem:[#allocation3] sm:$0xf] %vm362_vm2, %v791_v11 }
 0x123 PF: > { %p557_p5 = scmp.ne.s32.totalorder %s772_s2, 0 }
 0x125   : > { %367 = sbr.rel (%p557_p5) target bundleno = 427 (0x1ab), region = 52 }
 0x12a   : > { %vm369_vm3 = vcmask 125952   ;;  %v377_v13 = vmul.f32 %v931_v10, %v931_v10  ;;  %v368_v15 = vld [vmem:[#allocation2] sm:$0xf]  ;;  %vm374_vm4 = vcmask 3072   ;;  %v376_v18 = vld [vmem:[#allocation3] sm:$0xf] }
 0x12b   : > { %v370_v12 = vsel %vm369_vm3, %v931_v10, 0.0 }
 0x12c   : > { %371 = vadd.xlane.f32.xlu0 %v370_v12  ;;  %v378_v14 = vsel %vm369_vm3, %v377_v13, 0.0 }
 0x134   : > { %379 = vadd.xlane.f32.xlu0 %v378_v14 }
 0x19f   : > { %v372_v16 = vpop.xlane.xlu0 %371 }
 0x1a0   : > { %v373_v17 = vadd.f32 %v372_v16, %v368_v15 }
 0x1a2   : > { %375 = vst.msk [vmem:[#allocation2] sm:$0xf] %vm374_vm4, %v373_v17 }
 0x1a7   : > { %v380_v19 = vpop.xlane.xlu0 %379 }
 0x1a8   : > { %v381_v20 = vadd.f32 %v380_v19, %v376_v18 }
 0x1aa   : > { %382 = vst.msk [vmem:[#allocation3] sm:$0xf] %vm374_vm4, %v381_v20 }
 0x1ab PF: > { %p558_p7 = scmp.ne.s32.totalorder %s772_s2, 1 }
 0x1ac   : > { %s793_s26 = smov (!%p558_p7), 127  }
 0x1ad   : > { %386 = sbr.rel (%p558_p7) target bundleno = 591 (0x24f), region = 56 }
 0x1b2   : > { %v387_v21 = vld [vmem:[#allocation2] sm:$0xf]  ;;  %v389_v22 = vld [vmem:[#allocation3] sm:$0xf]  ;;  %v792_v23 = vmov 0   ;;  %vm434_vm8 = vcmask 125952  }
 0x1b3   : > { %652 = vset.pattern.permute.xlu0 %v792_v23  ;;  %v388_v24 = vmul.f32 0.03125, %v387_v21  ;;  %v390_v25 = vmul.f32 0.03125, %v389_v22  ;;  %653 = vset.pattern.permute.xlu1 %v792_v23  ;;  %v419_v26 = vld [vmem:[%s1000_s4] sm:$0xf] }
 0x1b4   : > { %422 = vperm.xlu1 %653, %v419_v26   ;;  %v427_v30 = vld [vmem:[%s926_s13] sm:$0xf] }
 0x1b5   : > { %409 = vperm.xlu0 %652, %v388_v24   ;;  %v391_v27 = vmul.f32 %v388_v24, %v388_v24  ;;  %v405_v38 = vld [vmem:[%s999_s3] sm:$0xf] }
 0x1b7   : > { %v392_v28 = vsub.f32 %v390_v25, %v391_v27 }
 0x1b9   : > { %v393_v29 = vmax.f32 %v392_v28, 0.0 }
 0x1bb   : > { %v394_v31 = vadd.f32 1e-05, %v393_v29 }
 0x1bc   : > { %429 = vrot.lane.b32.xlu1 %v427_v30, %s793_s26 }
 0x1bd   : > { %654 = vrsqrt.f32 %v394_v31  ;;  %vm401_vm5 = vweird.f32 %v394_v31 }
 0x1c3   : > { %v655_v32 = vpop.eup %654 }
 0x1c4   : > { %v396_v33 = vmul.f32 %v655_v32, %v394_v31  ;;  %vm402_vm6 = vweird.f32 %v655_v32 }
 0x1c5   : > { %vm403_vm7 = vmor %vm401_vm5, %vm402_vm6 }
 0x1c6   : > { %v397_v34 = vmul.f32 %v655_v32, %v396_v33 }
 0x1c8   : > { %v398_v35 = vmul.f32 0.5, %v397_v34 }
 0x1ca   : > { %v399_v36 = vsub.f32 1.5, %v398_v35 }
 0x1cc   : > { %v400_v37 = vmul.f32 %v655_v32, %v399_v36 }
 0x1ce   : > { %v404_v39 = vsel %vm403_vm7, %v655_v32, %v400_v37 }
 0x1cf   : > { %v406_v40 = vmul.f32 %v405_v38, %v404_v39 }
 0x1d1   : > { %415 = vperm.xlu0 %652, %v406_v40  }
 0x226   : > { %v423_v42 = vpop.permute.xlu1 %422 }
 0x227   : > { %v410_v41 = vpop.permute.xlu0 %409 }
 0x228   : > { %v412_v43 = vsub.f32 %v931_v10, %v410_v41 }
 0x22e   : > { %v430_v47 = vpop.permute.xlu1 %429 }
 0x243   : > { %v416_v44 = vpop.permute.xlu0 %415 }
 0x244   : > { %v418_v45 = vmul.f32 %v416_v44, %v412_v43 }
 0x246   : > { %v425_v46 = vadd.f32 %v423_v42, %v418_v45 }
 0x248   : > { %v426_v48 = vmax.f32 %v425_v46, 0.0 }
 0x24a   : > { %v432_v49 = vadd.f32 %v430_v47, %v426_v48 }
 0x24c   : > { %v433_v50 = vmax.f32 %v432_v49, 0.0 }
 0x24e   : > { %435 = vst.msk [vmem:[%s257_s16] sm:$0xf] %vm434_vm8, %v433_v50 }
 0x24f PF: > { %s444_s12 = smul.u32 %s768_s21, %s772_s2  ;;  %s452_s9 = sshll.u32 %s257_s16, 4  ;;  %s453_s9 = int_to_ptr.vmem [resolvable:$true] %s452_s9 }
 0x250   : > { %s437_s26 = scalar_lea.sflag [#allocation6], %s255_s30  ;;  %s706_s11 = scalar_lea.hbm %s1001_s5, 8 }
 0x251   : > { %s560_s13 = sshll.u32 %s444_s12, 2 }
 0x252   : > { %s450_s17 = scalar_lea.hbm %s1001_s5, %s560_s13 }
 0x253   : > { %s454_s25 = sshll.u32 %s450_s17, 4  ;;  %s455_s25 = int_to_ptr.hbm [resolvable:$true] %s454_s25 }
 0x254   : > { %s700_s29 = sshra.s32 %s455_s25, 4  ;;  %s701_s29 = int_to_ptr.hbm [resolvable:$true] %s700_s29 }
 0x255   : > { %s702_s8 = scalar_lea.hbm %s701_s29, 4  ;;  %p707_p12 = scmp.lt.s32.totalorder %s701_s29, %s1001_s5 }
 0x256   : > { %p703_p9 = scmp.ne.s32.totalorder %s701_s29, %s702_s8  ;;  %p708_p13 = scmp.lt.s32.totalorder %s706_s11, %s702_s8 }
 0x258   : > { %p704_p10 = pnand %p703_p9, %p878_p6  ;;  %p709_p0 = por %p708_p13, %p707_p12 }
 0x25a   : > { %p705_p11 = pneg %p704_p10 }
 0x25c   : > { %p710_p1 = pnand %p709_p0, %p705_p11 }
 0x25e   : > { %713 = shalt.err (!%p710_p1)
}
 0x25f   : > { %567 = dma.vmem_to_hbm [thread:$0]  (%p878_p6), %s453_s9, 64, %s455_s25, %s437_s26  }
 0x260 PF: > { %p579_p2 = scmp.ge.s32.totalorder %s784_s24, 2  ;;  %s466_s30 = sand.u32 1, %s756_s18  }
 0x261   : > { %s467_s13 = scalar_lea.sflag [#allocation6], %s466_s30 }
 0x262   : > { %p574_p3 = pnand %p579_p2, %p885_p8 }
 0x264   : > { %p575_p4 = pneg %p574_p3 }
 0x266   : > { %751 = dma.done.wait (%p575_p4), %s467_s13, 64  }
 0x267   : > { %753 = vsyncadd (%p575_p4), %s467_s13, 4294967232  ;;  %s19_s24 = sadd.s32 1, %s784_s24   ;;  %s1006_s18 = smov %s760_s19 }
 0x268   : > { %p16_p5 = scmp.ge.s32.totalorder %s19_s24, 6   ;;  %s1007_s19 = smov %s764_s20 }
 0x269   : > { %s1008_s20 = smov %s906_s15  ;;  %s1009_s21 = smov %s776_s22 }
 0x26a   : > { %s1010_s2 = smov %s780_s23  ;;  %s1011_s22 = smov %s1014_s27 }
 0x26b   : > { %s1012_s23 = smov %s1018_s28  ;;  %18 = sbr.rel (!%p16_p5) target bundleno = 6 (0x6), region = 94 }
 0x270   :  { %473 = vsyncpa [#allocation5], 1 }
 0x271   :  { %475 = vsyncpa [#allocation5 + $0x1], 1 }
 0x272   :  { %476 = vsyncpa [#allocation6], 1 }
 0x273   :  { %478 = vsyncpa [#allocation6 + $0x1], 1 }

</bundles_post_ra>
